<compile_context>
chip_gen: v5e
topology: v5e:2x2
jax: 0.10.0
libtpu: 0.0.40
codegen_flags: <defaults>
</compile_context>

<pallas_src>
import functools

import jax
import jax.numpy as jnp
from jax.experimental import pallas as pl
from jax.experimental.pallas import tpu as pltpu

KERNEL_SIZE = 7
PADDING = 3  # kernel_size == 7 -> padding 3 (as in the PyTorch module)


def _vmem_capacity_bytes():
    try:
        info = pltpu.get_tpu_info()
        cap = getattr(info, "vmem_capacity_bytes", None)
        if cap:
            return int(cap)
    except Exception:
        pass
    return 128 << 20  # assume a 128-MiB part if the query is unavailable


def _divisors(n):
    return [d for d in range(1, n + 1) if n % d == 0]


# ---------------------------------------------------------------------------
# Kernel A: channel mean / max over a lane-dense (B, C, H*W) view of x.
# ---------------------------------------------------------------------------
def _reduce_kernel(x_ref, avg_ref, max_ref, *, c_total):
    # x_ref:   (Bt, Ct, HWt) input block (native dtype)
    # avg_ref: (Bt, HWt) f32 output block, resident across the channel axis
    # max_ref: (Bt, HWt) output block (native dtype), resident across channels
    k = pl.program_id(2)

    xb = x_ref[...]                                   # (Bt, Ct, HWt)
    s = jnp.sum(xb.astype(jnp.float32), axis=1)       # f32 sum over channels
    m = jnp.max(xb, axis=1)                           # max in native dtype

    @pl.when(k == 0)
    def _init():
        avg_ref[...] = s
        max_ref[...] = m

    @pl.when(k > 0)
    def _accum():
        avg_ref[...] = avg_ref[...] + s
        max_ref[...] = jnp.maximum(max_ref[...], m)

    @pl.when(k == pl.num_programs(2) - 1)
    def _finalize():
        avg_ref[...] = avg_ref[...] * (1.0 / c_total)  # true C, not chunk size


def _channel_reduce(x3, *, big_vmem):
    """x3: (B, C, HW). Returns (avg_flat f32, max_flat x.dtype), each (B, HW)."""
    B, C, HW = x3.shape
    itemsize = jnp.dtype(x3.dtype).itemsize
    target_block_bytes = (12 << 20) if big_vmem else (6 << 20)

    # Batch tile: multiple of 8 (VMEM sublane tiling on the 2-D outputs) or
    # full B.  Keep it small so the batch axis stays splittable.
    bt_valid = [d for d in _divisors(B) if d % 8 == 0] or [B]
    Bt = min(bt_valid)

    # Channel tile: multiple of 8 (sublane axis of the input block) or full C.
    ct_valid = sorted(set([d for d in _divisors(C) if d % 8 == 0] + [C]))
    # Spatial tile: multiple of 128 (lane axis) or the full flattened plane.
    hw_valid = sorted(set([d for d in _divisors(HW) if d % 128 == 0] + [HW]))

    def blk_bytes(bt, ct, hwt):
        return bt * (-(-ct // 8) * 8) * (-(-hwt // 128) * 128) * itemsize

    # Largest (HWt, Ct) combination whose input block fits the per-step target.
    HWt, Ct = min(hw_valid), min(ct_valid)
    for hwt in sorted(hw_valid, reverse=True):
        fits = [ct for ct in ct_valid if blk_bytes(Bt, ct, hwt) <= target_block_bytes]
        if fits:
            HWt, Ct = hwt, max(fits)
            break

    # v7x megacore: make sure the "parallel" axes have at least 2 steps when
    # a smaller spatial tile exists (no-op on 1-TensorCore v5e/v6e).
    if (B // Bt) * (HW // HWt) < 2:
        smaller = [h for h in hw_valid if h < HWt]
        if smaller:
            HWt = max(smaller)

    grid = (B // Bt, HW // HWt, C // Ct)

    def out_plane_bytes(isz):
        return (-(-Bt // 8) * 8) * (-(-HWt // 128) * 128) * isz

    in_blk = blk_bytes(Bt, Ct, HWt)
    out_blk = out_plane_bytes(4) + out_plane_bytes(itemsize)
    vmem_need = 2 * (in_blk + out_blk) + (2 << 20)
    vmem_cap = (96 << 20) if big_vmem else (30 << 20)
    vmem_limit = int(min(max(vmem_need, 8 << 20), vmem_cap))

    cost = pl.CostEstimate(
        flops=int(2 * B * C * HW),
        transcendentals=0,
        bytes_accessed=int(B * C * HW * itemsize + B * HW * (4 + itemsize)),
    )

    kernel = functools.partial(_reduce_kernel, c_total=C)

    avg_flat, max_flat = pl.pallas_call(
        kernel,
        out_shape=(jax.ShapeDtypeStruct((B, HW), jnp.float32),
                   jax.ShapeDtypeStruct((B, HW), x3.dtype)),
        grid_spec=pltpu.PrefetchScalarGridSpec(
            num_scalar_prefetch=0,
            grid=grid,
            in_specs=[pl.BlockSpec((Bt, Ct, HWt), lambda b, s, k: (b, k, s))],
            out_specs=[pl.BlockSpec((Bt, HWt), lambda b, s, k: (b, s)),
                       pl.BlockSpec((Bt, HWt), lambda b, s, k: (b, s))],
        ),
        compiler_params=pltpu.CompilerParams(
            dimension_semantics=("parallel", "parallel", "arbitrary"),
            vmem_limit_bytes=vmem_limit,
        ),
        cost_estimate=cost,
    )(x3)
    return avg_flat, max_flat


# ---------------------------------------------------------------------------
# Kernel B: zero-padded 7x7 conv over [avg, max] + sigmoid.
# ---------------------------------------------------------------------------
def _conv_kernel(w_ref, avg_ref, max_ref, o_ref, pad_ref):
    # w_ref:   (98,) SMEM flattened conv weights (scalar-prefetched), OIHW order
    # avg_ref: (Bt, H, W) f32 mean plane
    # max_ref: (Bt, H, W) max plane (native dtype)
    # o_ref:   (Bt, 1, H, W) output block
    # pad_ref: (2, Bt, H+6, W+6) f32 zero-padded [avg, max] scratch
    bt, h, w = avg_ref.shape

    @pl.when(pl.program_id(0) == 0)
    def _zero_halo():
        # Only the interior is ever written afterwards, so the halo stays 0
        # for every later batch block (axis is "arbitrary" => sequential).
        pad_ref[...] = jnp.zeros(pad_ref.shape, pad_ref.dtype)

    pad_ref[0, :, PADDING:PADDING + h, PADDING:PADDING + w] = avg_ref[...]
    pad_ref[1, :, PADDING:PADDING + h, PADDING:PADDING + w] = (
        max_ref[...].astype(jnp.float32))

    kk = KERNEL_SIZE * KERNEL_SIZE
    acc0 = jnp.zeros((bt, h, w), jnp.float32)   # avg-channel chain
    acc1 = jnp.zeros((bt, h, w), jnp.float32)   # max-channel chain (indep. ILP)
    for ki in range(KERNEL_SIZE):
        for kj in range(KERNEL_SIZE):
            tap = ki * KERNEL_SIZE + kj
            acc0 = acc0 + pad_ref[0, :, ki:ki + h, kj:kj + w] * w_ref[tap]
            acc1 = acc1 + pad_ref[1, :, ki:ki + h, kj:kj + w] * w_ref[kk + tap]

    o_ref[:, 0, :, :] = jax.nn.sigmoid(acc0 + acc1).astype(o_ref.dtype)


def _conv_sigmoid(avg, mx, w_flat, out_dtype, *, big_vmem):
    """avg: (B, H, W) f32; mx: (B, H, W); w_flat: (98,) f32 -> (B, 1, H, W)."""
    B, H, W = avg.shape
    Hp, Wp = H + 2 * PADDING, W + 2 * PADDING

    bt_cap = max(1, min(8, B // 2)) if B >= 2 else 1
    Bt = max(d for d in _divisors(B) if d <= bt_cap)

    def plane_bytes(h, w, isz):
        return (-(-h // 8) * 8) * (-(-w // 128) * 128) * isz

    mx_isz = jnp.dtype(mx.dtype).itemsize
    out_isz = jnp.dtype(out_dtype).itemsize
    in_blk = Bt * (plane_bytes(H, W, 4) + plane_bytes(H, W, mx_isz))
    out_blk = Bt * plane_bytes(H, W, out_isz)
    scratch = 2 * Bt * plane_bytes(Hp, Wp, 4)
    vmem_cap = (64 << 20) if big_vmem else (28 << 20)
    vmem_limit = int(min(max(2 * (in_blk + out_blk) + scratch + (2 << 20),
                             8 << 20), vmem_cap))

    cost = pl.CostEstimate(
        flops=int(B * H * W * (4 * KERNEL_SIZE * KERNEL_SIZE + 2)),
        transcendentals=int(B * H * W),                       # sigmoid
        bytes_accessed=int(B * H * W * (4 + mx_isz + out_isz) + w_flat.size * 4),
    )

    return pl.pallas_call(
        _conv_kernel,
        out_shape=jax.ShapeDtypeStruct((B, 1, H, W), out_dtype),
        grid_spec=pltpu.PrefetchScalarGridSpec(
            num_scalar_prefetch=1,                            # conv weights -> SMEM
            grid=(B // Bt,),
            in_specs=[pl.BlockSpec((Bt, H, W), lambda b, w_ref: (b, 0, 0)),
                      pl.BlockSpec((Bt, H, W), lambda b, w_ref: (b, 0, 0))],
            out_specs=pl.BlockSpec((Bt, 1, H, W), lambda b, w_ref: (b, 0, 0, 0)),
            scratch_shapes=[pltpu.VMEM((2, Bt, Hp, Wp), jnp.float32)],
        ),
        compiler_params=pltpu.CompilerParams(
            # "arbitrary": the zero-once halo trick needs sequential scratch.
            dimension_semantics=("arbitrary",),
            vmem_limit_bytes=vmem_limit,
        ),
        cost_estimate=cost,
    )(w_flat, avg, mx)


# ---------------------------------------------------------------------------
# Public wrapper
# ---------------------------------------------------------------------------
def spatial_attention(x, conv_weight):
    """x: (B, C, H, W); conv_weight: (1, 2, 7, 7). Returns (B, 1, H, W)."""
    B, C, H, W = x.shape
    assert conv_weight.shape == (1, 2, KERNEL_SIZE, KERNEL_SIZE)
    big_vmem = _vmem_capacity_bytes() >= (96 << 20)           # v5e/v6e vs v7x

    x3 = x.reshape(B, C, H * W)                               # free relabel
    avg_flat, max_flat = _channel_reduce(x3, big_vmem=big_vmem)
    avg = avg_flat.reshape(B, H, W)
    mx = max_flat.reshape(B, H, W)

    w_flat = conv_weight.astype(jnp.float32).reshape(-1)      # (98,), OIHW order
    return _conv_sigmoid(avg, mx, w_flat, out_dtype=x.dtype, big_vmem=big_vmem)


def _reference(x, conv_weight):
    """Pure-JAX reference mirroring the PyTorch forward."""
    avg_out = jnp.mean(x, axis=1, keepdims=True)
    max_out = jnp.max(x, axis=1, keepdims=True)
    x_cat = jnp.concatenate([avg_out, max_out], axis=1)       # (B, 2, H, W)
    y = jax.lax.conv_general_dilated(
        x_cat, conv_weight,
        window_strides=(1, 1),
        padding=((PADDING, PADDING), (PADDING, PADDING)),
        dimension_numbers=("NCHW", "OIHW", "NCHW"),
    )
    return jax.nn.sigmoid(y)


if __name__ == "__main__":
    key = jax.random.PRNGKey(0)
    k_x, k_w = jax.random.split(key)

    B, C, H, W = 2, 4, 16, 16
    x = jax.random.normal(k_x, (B, C, H, W), dtype=jnp.float32)
    # Deterministic conv weight init (kaiming-uniform-ish, fan_in = 2*7*7).
    fan_in = 2 * KERNEL_SIZE * KERNEL_SIZE
    bound = (1.0 / fan_in) ** 0.5
    conv_weight = jax.random.uniform(
        k_w, (1, 2, KERNEL_SIZE, KERNEL_SIZE),
        minval=-bound, maxval=bound, dtype=jnp.float32)

    out = spatial_attention(x, conv_weight)
    out = jax.block_until_ready(out)

    ref = _reference(x, conv_weight)
    assert out.shape == (B, 1, H, W)
    assert jnp.allclose(out, ref, atol=1e-5, rtol=1e-5), "mismatch vs reference"

    print("KERNEL_OK")
</pallas_src>

<mosaic_0001>
module attributes {stable_mosaic.version = 11 : i64} {
  func.func @_reduce_kernel(%arg0: i32, %arg1: i32, %arg2: i32, %arg3: memref<2x4x128xf32, #tpu.memory_space<vmem>>, %arg4: memref<2x128xf32, #tpu.memory_space<vmem>>, %arg5: memref<2x128xf32, #tpu.memory_space<vmem>>) attributes {dimension_semantics = [#tpu.dimension_semantics<parallel>, #tpu.dimension_semantics<parallel>, #tpu.dimension_semantics<arbitrary>], iteration_bounds = array<i64: 1, 2, 1>, scalar_prefetch = 0 : i64, scratch_operands = 0 : i64, tpu.core_type = #tpu.core_type<tc>, window_params = [{transform_indices = @transform_0, window_bounds = array<i64: 2, 4, 128>}, {transform_indices = @transform_1, window_bounds = array<i64: 2, 128>}, {transform_indices = @transform_2, window_bounds = array<i64: 2, 128>}]} {
    %c0 = arith.constant 0 : index
    %c0_0 = arith.constant 0 : index
    %c0_1 = arith.constant 0 : index
    %0 = vector.load %arg3[%c0, %c0_0, %c0_1] : memref<2x4x128xf32, #tpu.memory_space<vmem>>, vector<2x4x128xf32>
    %cst = arith.constant dense<0.000000e+00> : vector<2x128xf32>
    %1 = vector.multi_reduction <add>, %0, %cst [1] : vector<2x4x128xf32> to vector<2x128xf32>
    %cst_2 = arith.constant dense<0xFF800000> : vector<2x128xf32>
    %2 = vector.multi_reduction <maximumf>, %0, %cst_2 [1] : vector<2x4x128xf32> to vector<2x128xf32>
    %c0_i32 = arith.constant 0 : i32
    %3 = arith.cmpi eq, %arg2, %c0_i32 : i32
    %4 = arith.extui %3 : i1 to i32
    %c0_i32_3 = arith.constant 0 : i32
    %5 = arith.cmpi ne, %4, %c0_i32_3 : i32
    scf.if %5 {
      %c0_8 = arith.constant 0 : index
      %c0_9 = arith.constant 0 : index
      %12 = vector.load %arg4[%c0_8, %c0_9] : memref<2x128xf32, #tpu.memory_space<vmem>>, vector<2x128xf32>
      tpu.vector_store %arg4[%c0_8, %c0_9], %1 {strides = array<i32>} : memref<2x128xf32, #tpu.memory_space<vmem>>, vector<2x128xf32>,
      %c0_10 = arith.constant 0 : index
      %c0_11 = arith.constant 0 : index
      %13 = vector.load %arg5[%c0_10, %c0_11] : memref<2x128xf32, #tpu.memory_space<vmem>>, vector<2x128xf32>
      tpu.vector_store %arg5[%c0_10, %c0_11], %2 {strides = array<i32>} : memref<2x128xf32, #tpu.memory_space<vmem>>, vector<2x128xf32>,
    } else {
    }
    %c0_i32_4 = arith.constant 0 : i32
    %6 = arith.cmpi sgt, %arg2, %c0_i32_4 : i32
    %7 = arith.extui %6 : i1 to i32
    %c0_i32_5 = arith.constant 0 : i32
    %8 = arith.cmpi ne, %7, %c0_i32_5 : i32
    scf.if %8 {
      %c0_8 = arith.constant 0 : index
      %c0_9 = arith.constant 0 : index
      %12 = vector.load %arg4[%c0_8, %c0_9] : memref<2x128xf32, #tpu.memory_space<vmem>>, vector<2x128xf32>
      %13 = arith.addf %12, %1 : vector<2x128xf32>
      %c0_10 = arith.constant 0 : index
      %c0_11 = arith.constant 0 : index
      %14 = vector.load %arg4[%c0_10, %c0_11] : memref<2x128xf32, #tpu.memory_space<vmem>>, vector<2x128xf32>
      tpu.vector_store %arg4[%c0_10, %c0_11], %13 {strides = array<i32>} : memref<2x128xf32, #tpu.memory_space<vmem>>, vector<2x128xf32>,
      %c0_12 = arith.constant 0 : index
      %c0_13 = arith.constant 0 : index
      %15 = vector.load %arg5[%c0_12, %c0_13] : memref<2x128xf32, #tpu.memory_space<vmem>>, vector<2x128xf32>
      %16 = arith.maximumf %15, %2 : vector<2x128xf32>
      %c0_14 = arith.constant 0 : index
      %c0_15 = arith.constant 0 : index
      %17 = vector.load %arg5[%c0_14, %c0_15] : memref<2x128xf32, #tpu.memory_space<vmem>>, vector<2x128xf32>
      tpu.vector_store %arg5[%c0_14, %c0_15], %16 {strides = array<i32>} : memref<2x128xf32, #tpu.memory_space<vmem>>, vector<2x128xf32>,
    } else {
    }
    %c0_i32_6 = arith.constant 0 : i32
    %9 = arith.cmpi eq, %arg2, %c0_i32_6 : i32
    %10 = arith.extui %9 : i1 to i32
    %c0_i32_7 = arith.constant 0 : i32
    %11 = arith.cmpi ne, %10, %c0_i32_7 : i32
    scf.if %11 {
      %c0_8 = arith.constant 0 : index
      %c0_9 = arith.constant 0 : index
      %12 = vector.load %arg4[%c0_8, %c0_9] : memref<2x128xf32, #tpu.memory_space<vmem>>, vector<2x128xf32>
      %cst_10 = arith.constant 2.500000e-01 : f32
      %13 = vector.broadcast %cst_10 : f32 to vector<2x128xf32>
      %14 = arith.mulf %12, %13 : vector<2x128xf32>
      %c0_11 = arith.constant 0 : index
      %c0_12 = arith.constant 0 : index
      %15 = vector.load %arg4[%c0_11, %c0_12] : memref<2x128xf32, #tpu.memory_space<vmem>>, vector<2x128xf32>
      tpu.vector_store %arg4[%c0_11, %c0_12], %14 {strides = array<i32>} : memref<2x128xf32, #tpu.memory_space<vmem>>, vector<2x128xf32>,
    } else {
    }
    return
  }
  func.func @transform_0(%arg0: i32, %arg1: i32, %arg2: i32) -> (i32, i32, i32) {
    %c0_i32 = arith.constant 0 : i32
    return %arg0, %arg2, %arg1 : i32, i32, i32
  }
  func.func @transform_1(%arg0: i32, %arg1: i32, %arg2: i32) -> (i32, i32) {
    %c0_i32 = arith.constant 0 : i32
    return %arg0, %arg1 : i32, i32
  }
  func.func @transform_2(%arg0: i32, %arg1: i32, %arg2: i32) -> (i32, i32) {
    %c0_i32 = arith.constant 0 : i32
    return %arg0, %arg1 : i32, i32
  }
}

</mosaic_0001>

<bundles_post_ra>
// kernel: tpu_custom_call.1
= control target key start
LH: loop header
LB: loop body
LE: loop exit
PB: predicated region body
PF: predicated region fallthrough
CT: control target
= control target key end

     0   :  { %8 = vsyncpa [#allocation3], 0  ;;  %s828_s0 = inlined_call_operand.hbm [shape: f32[2,4,256], index: 0, kind: input, shape index: {}]   ;;  %s829_s1 = inlined_call_operand.hbm [shape: f32[2,256], index: 1, kind: output, shape index: {0}]   ;;  %s830_s2 = inlined_call_operand.hbm [shape: f32[2,256], index: 2, kind: output, shape index: {1}]  }
   0x1   :  { %10 = vsyncpa [#allocation3 + $0x1], 0 }
   0x2   :  { %11 = vsyncpa [#allocation4], 0 }
   0x3   :  { %13 = vsyncpa [#allocation4 + $0x1], 0 }
   0x4   :  { %14 = vsyncpa [#allocation7], 0 }
   0x5   :  { %16 = vsyncpa [#allocation7 + $0x1], 0  ;;  %s689_s9 = smov 0   ;;  %s691_s10 = smov 0  }
   0x6   :  { %s693_s11 = smov 0   ;;  %s695_s12 = smov 0  }
   0x7   :  { %s697_s13 = smov 0   ;;  %s699_s14 = smov 0  }
   0x8 LB: > { %s439_s15 = sadd.s32 4294967295, %s669_s14   ;;  %s440_s16 = sadd.s32 4294967294, %s669_s14   ;;  %s669_s14 = sphi %s699_s14, %s22_s14   ;;  %s665_s13 = sphi %s697_s13, %s839_s13   ;;  %s661_s12 = sphi %s695_s12, %s838_s12   ;;  %s657_s11 = sphi %s693_s11, %s837_s11   ;;  %s653_s10 = sphi %s691_s10, %s836_s10   ;;  %s649_s9 = sphi %s689_s9, %s835_s9  }
   0x9   : > { %s37_s17 = sadd.s32 1, %s665_s13  ;;  %s52_s18 = sadd.s32 1, %s657_s11 }
   0xa   : > { %p39_p0 = scmp.ge.s32.totalorder %s37_s17, 2  ;;  %p59_p1 = scmp.ne.s32.totalorder %s657_s11, %s653_s10 }
   0xb   : > { %p60_p2 = scmp.eq.s32.totalorder %s669_s14, 0  ;;  %p65_p3 = scmp.ne.s32.totalorder %s653_s10, %s649_s9 }
   0xc   : > { %s841_s17 = smov (%p39_p0, %s37_s17), 0  ;;  %p66_p5 = scmp.eq.s32.totalorder %s439_s15, 0 }
   0xd   : > { %p730_p4 = por %p60_p2, %p59_p1  ;;  %s48_s20 = ssub.s32 %s665_s13, %s841_s17 }
   0xe   : > { %p91_p6 = scmp.eq.s32.totalorder %s439_s15, 1  ;;  %p50_p7 = scmp.eq.s32.totalorder %s48_s20, 0 }
   0xf   : > { %p736_p8 = por %p66_p5, %p65_p3  ;;  %p97_p10 = scmp.eq.s32.totalorder %s440_s16, 1 }
  0x10   : > { %p740_p9 = por %p91_p6, %p59_p1  ;;  %p442_p12 = scmp.ge.s32.totalorder %s669_s14, 2 }
  0x11   : > { %s745_s23 = scalar_select %p50_p7, %s657_s11, %s52_s18  }
  0x12   : > { %p747_p11 = por %p97_p10, %p65_p3  ;;  %p472_p13 = scmp.lt.s32.totalorder %s669_s14, 2 }
  0x13   : > { %s145_s25 = sand.u32 1, %s657_s11   ;;  %s444_s27 = sshll.u32 %s665_s13, 2 }
  0x14   : > { %s443_s26 = sshll.u32 %s145_s25, 3  ;;  %s158_s30 = scalar_lea.hbm %s828_s0, %s444_s27 }
  0x15   : > { %s149_s3 = scalar_lea.vmem [#allocation2], %s443_s26  ;;  %s159_s5 = sshll.u32 %s158_s30, 4  ;;  %s160_s5 = int_to_ptr.hbm [resolvable:$true] %s159_s5 }
  0x16   : > { %s161_s4 = sshll.u32 %s149_s3, 4  ;;  %p462_p0 = pnand %p472_p13, %p730_p4  ;;  %s162_s4 = int_to_ptr.vmem [resolvable:$true] %s161_s4 }
  0x17   : > { %s146_s6 = scalar_lea.sflag [#allocation3], %s145_s25  ;;  %s671_s7 = smov 128  }
  0x18   : > { %s672_s8 = smov 64   ;;  %s673_s15 = smov 4  }
  0x19   : > { %464 = dma.hbm_to_vmem [thread:$0]  (!%p462_p0), %s160_s5, 128, %s162_s4, %s146_s6, %s671_s7, %s672_s8, %s673_s15  }
  0x1a   : > { %p445_p1 = scmp.ge.s32.totalorder %s669_s14, 1  ;;  %p169_p2 = scmp.lt.s32.totalorder %s669_s14, 3 }
  0x1c   : > { %p170_p3 = pnand %p445_p1, %p169_p2 }
  0x1d   : > { %s763_s16 = sand.u32 (!%p170_p3), 1, %s653_s10  }
  0x1e   : > { %173 = sbr.rel (%p170_p3) target bundleno = 68 (0x44), region = 24  ;;  %s446_s18 = sshll.u32 (!%p170_p3), %s763_s16, 3 }
  0x1f   : > { %s176_s20 = scalar_lea.sflag (!%p170_p3), [#allocation3], %s763_s16  ;;  %s179_s26 = scalar_lea.vmem (!%p170_p3), [#allocation2], %s446_s18 }
  0x23   : > { %636 = dma.done.wait (%p736_p8), %s176_s20, 128  }
  0x24   : > { %638 = vsyncadd (%p736_p8), %s176_s20, 4294967168  ;;  %vm209_vm0 = vcmask 1043456   ;;  %v207_v0 = vld [vmem:[%s179_s26] sm:$0xf]  ;;  %v208_v1 = vld [vmem:[%s179_s26 + $0x4] sm:$0xf] }
  0x25   : > { %v210_v2 = vsel %vm209_vm0, %v207_v0, 0.0  ;;  %v217_v3 = vsel %vm209_vm0, %v208_v1, 0.0  ;;  %v224_v4 = vsel %vm209_vm0, %v207_v0, -inf  ;;  %v231_v5 = vsel %vm209_vm0, %v208_v1, -inf  ;;  %s451_s19 = sshll.u32 %s661_s12, 1  ;;  %s447_s21 = sshll.u32 %s763_s16, 1 }
  0x26   : > { %v211_v6 = vrot.slane %v210_v2, 4  ;;  %v218_v7 = vrot.slane %v217_v3, 4  ;;  %v225_v8 = vrot.slane %v224_v4, 4  ;;  %v232_v9 = vrot.slane %v231_v5, 4  ;;  %s312_s28 = scalar_lea.hbm %s830_s2, %s451_s19  ;;  %s205_s29 = scalar_lea.vmem [#allocation6], %s447_s21 }
  0x27   : > { %s314_s30 = sshll.u32 %s205_s29, 4  ;;  %vm244_vm1 = vcmask 1041409   ;;  %s316_s3 = sshll.u32 %s312_s28, 4  ;;  %s315_s30 = int_to_ptr.vmem [resolvable:$true] %s314_s30  ;;  %s317_s3 = int_to_ptr.hbm [resolvable:$true] %s316_s3 }
  0x28   : > { %v212_v10 = vadd.f32 %v211_v6, %v210_v2  ;;  %v219_v11 = vadd.f32 %v218_v7, %v217_v3  ;;  %v226_v12 = vmax.f32 %v224_v4, %v225_v8  ;;  %v233_v13 = vmax.f32 %v231_v5, %v232_v9  ;;  %s198_s4 = scalar_lea.vmem [#allocation5], %s447_s21  ;;  %s296_s7 = scalar_lea.hbm %s829_s1, %s451_s19 }
  0x29   : > { %s284_s8 = scalar_lea.sflag [#allocation7], %s763_s16  ;;  %s569_s15 = sshra.s32 %s317_s3, 4  ;;  %s570_s15 = int_to_ptr.hbm [resolvable:$true] %s569_s15 }
  0x2a   : > { %v213_v14 = vrot.slane %v212_v10, 2  ;;  %v220_v15 = vrot.slane %v219_v11, 2  ;;  %v227_v16 = vrot.slane %v226_v12, 2  ;;  %v234_v17 = vrot.slane %v233_v13, 2  ;;  %s571_s18 = scalar_lea.hbm %s570_s15, 2  ;;  %s575_s25 = scalar_lea.hbm %s830_s2, 4 }
  0x2b   : > { %p572_p4 = scmp.ne.s32.totalorder %s570_s15, %s571_s18  ;;  %p576_p7 = scmp.lt.s32.totalorder %s570_s15, %s830_s2 }
  0x2c   : > { %v214_v18 = vadd.f32 %v213_v14, %v212_v10  ;;  %v221_v19 = vadd.f32 %v220_v15, %v219_v11  ;;  %v228_v20 = vmax.f32 %v226_v12, %v227_v16  ;;  %v235_v21 = vmax.f32 %v233_v13, %v234_v17  ;;  %p577_p8 = scmp.lt.s32.totalorder %s575_s25, %s571_s18 }
  0x2d   : > { %p573_p5 = pnand %p572_p4, %p740_p9 }
  0x2e   : > { %v215_v22 = vrot.slane %v214_v18, 1  ;;  %v222_v23 = vrot.slane %v221_v19, 1  ;;  %v229_v24 = vrot.slane %v228_v20, 1  ;;  %v236_v25 = vrot.slane %v235_v21, 1  ;;  %p578_p10 = por %p577_p8, %p576_p7 }
  0x2f   : > { %p574_p6 = pneg %p573_p5 }
  0x30   : > { %v216_v26 = vadd.f32 %v215_v22, %v214_v18  ;;  %v223_v27 = vadd.f32 %v222_v23, %v221_v19  ;;  %v230_v28 = vmax.f32 %v228_v20, %v229_v24  ;;  %v237_v29 = vmax.f32 %v235_v21, %v236_v25 }
  0x31   : > { %p579_p13 = pnand %p578_p10, %p574_p6 }
  0x32   : > { %v245_v30 = vsel %vm244_vm1, %v223_v27, %v216_v26  ;;  %v250_v31 = vsel %vm244_vm1, %v237_v29, %v230_v28 }
  0x33   : > { %247 = vst [vmem:[%s198_s4] sm:$0x3] %v245_v30 }
  0x34   : > { %252 = vst [vmem:[%s205_s29] sm:$0x3] %v250_v31 }
  0x35   : > { %582 = shalt.err (!%p579_p13)
}
  0x36   : > { %458 = dma.vmem_to_hbm [thread:$0]  (%p740_p9), %s315_s30, 32, %s317_s3, %s284_s8  }
  0x37   : > { %s298_s12 = sshll.u32 %s198_s4, 4  ;;  %s300_s19 = sshll.u32 %s296_s7, 4  ;;  %s299_s12 = int_to_ptr.vmem [resolvable:$true] %s298_s12  ;;  %s301_s19 = int_to_ptr.hbm [resolvable:$true] %s300_s19 }
  0x38   : > { %s279_s28 = scalar_lea.sflag [#allocation4], %s763_s16  ;;  %s597_s29 = sshra.s32 %s301_s19, 4  ;;  %s598_s29 = int_to_ptr.hbm [resolvable:$true] %s597_s29 }
  0x39   : > { %s599_s5 = scalar_lea.hbm %s598_s29, 2  ;;  %s603_s18 = scalar_lea.hbm %s829_s1, 4 }
  0x3a   : > { %v275_v32 = vld [vmem:[%s198_s4] sm:$0x3]  ;;  %p600_p0 = scmp.ne.s32.totalorder %s598_s29, %s599_s5  ;;  %p604_p3 = scmp.lt.s32.totalorder %s598_s29, %s829_s1 }
  0x3b   : > { %v276_v33 = vmul.f32 0.25, %v275_v32  ;;  %p605_p4 = scmp.lt.s32.totalorder %s603_s18, %s599_s5 }
  0x3c   : > { %p601_p1 = pnand %p600_p0, %p740_p9 }
  0x3d   : > { %277 = vst [vmem:[%s198_s4] sm:$0x3] %v276_v33  ;;  %p606_p5 = por %p605_p4, %p604_p3 }
  0x3e   : > { %p602_p2 = pneg %p601_p1 }
  0x40   : > { %p607_p6 = pnand %p606_p5, %p602_p2 }
  0x42   : > { %610 = shalt.err (!%p607_p6)
}
  0x43   : > { %457 = dma.vmem_to_hbm [thread:$0]  (%p740_p9), %s299_s12, 32, %s301_s19, %s279_s28  }
  0x44 PF: > { %s328_s16 = sand.u32 1, %s649_s9   ;;  %p466_p7 = pnand %p442_p12, %p747_p11 }
  0x45   : > { %s329_s4 = scalar_lea.sflag [#allocation4], %s328_s16 }
  0x46   : > { %p467_p8 = pneg %p466_p7 }
  0x48   : > { %640 = dma.done.wait (%p467_p8), %s329_s4, 32  }
  0x49   : > { %642 = vsyncadd (%p467_p8), %s329_s4, 4294967264  ;;  %s339_s7 = scalar_lea.sflag [#allocation7], %s328_s16 }
  0x4a   : > { %644 = dma.done.wait (%p467_p8), %s339_s7, 32  }
  0x4b   : > { %646 = vsyncadd (%p467_p8), %s339_s7, 4294967264  ;;  %s22_s14 = sadd.s32 1, %s669_s14   ;;  %s835_s9 = smov %s653_s10 }
  0x4c   : > { %p19_p10 = scmp.ge.s32.totalorder %s22_s14, 4   ;;  %s836_s10 = smov %s657_s11 }
  0x4d   : > { %s837_s11 = smov %s745_s23  ;;  %s838_s12 = smov %s665_s13 }
  0x4e   : > { %s839_s13 = smov %s841_s17  ;;  %21 = sbr.rel (!%p19_p10) target bundleno = 8 (0x8), region = 98 }
  0x53   :  { %345 = vsyncpa [#allocation3], 1 }
  0x54   :  { %347 = vsyncpa [#allocation3 + $0x1], 1 }
  0x55   :  { %348 = vsyncpa [#allocation4], 1 }
  0x56   :  { %350 = vsyncpa [#allocation4 + $0x1], 1 }
  0x57   :  { %351 = vsyncpa [#allocation7], 1 }
  0x58   :  { %353 = vsyncpa [#allocation7 + $0x1], 1 }

</bundles_post_ra>
